<compile_context>
chip_gen: v5e
topology: v5e:2x2
jax: 0.10.0
libtpu: 0.0.40
codegen_flags: <defaults>
</compile_context>

<pallas_src>
import jax
import jax.numpy as jnp
from jax.experimental import pallas as pl
from jax.experimental.pallas import tpu as pltpu


def _round_up(x, m):
    return ((x + m - 1) // m) * m


def _combiner_kernel(head_t_ref, mod_t_ref, w1_ref, b1_ref, w2_ref, b2_ref,
                     o_ref):
    # head_t_ref / mod_t_ref : (E, TB)  activation tile (batch on lane axis)
    # w1_ref                 : (E, 2E) bf16  == PyTorch linear1.weight
    # b1_ref / b2_ref        : (E, 1)  f32   column biases
    # w2_ref                 : (E, E)  bf16  == PyTorch linear2.weight
    # o_ref                  : (E, TB) lane-dense output tile
    cdt = w1_ref.dtype
    # Fused layer 1: x^T = [head^T ; mod^T] -> single K=2E matmul.
    x = jnp.concatenate([head_t_ref[...], mod_t_ref[...]], axis=0).astype(cdt)
    z = jnp.dot(w1_ref[...], x, preferred_element_type=jnp.float32) + b1_ref[...]
    t = jnp.tanh(z)
    out = (jnp.dot(w2_ref[...], t.astype(cdt),
                   preferred_element_type=jnp.float32) + b2_ref[...])
    o_ref[...] = out.astype(o_ref.dtype)


def prepare_params(params, compute_dtype=jnp.bfloat16):
    """One-time (non-hot-path) weight preparation.

    In the batch-on-lanes layout the PyTorch (out, in) weights are used
    directly (no transpose); only the bf16 cast and bias reshape happen here.
    """
    E = params["b1"].shape[0]
    return {
        "w1": params["w1"].astype(compute_dtype),               # (E, 2E)
        "b1": params["b1"].reshape(E, 1).astype(jnp.float32),   # (E, 1)
        "w2": params["w2"].astype(compute_dtype),               # (E, E)
        "b2": params["b2"].reshape(E, 1).astype(jnp.float32),   # (E, 1)
    }


def _choose_tile(B, block_b):
    """Batch (lane) tile: multiple of 128, >=2 tiles when B > 128 (megacore)."""
    if B <= 128:
        return B                              # single block == full array dim
    block_b = max(128, (block_b // 128) * 128)
    return min(block_b, _round_up(pl.cdiv(B, 2), 128))


def mlp_combiner_forward_t(head_t, modifier_t, prepared, *, block_b=4096):
    """Pallas forward in the lane-dense (transposed) layout.

    head_t, modifier_t : (E, B) arrays (batch on the LAST axis), f32 or bf16.
    prepared           : output of prepare_params()
    returns            : (E, B), dtype follows the inputs.
    """
    E, B = head_t.shape
    assert modifier_t.shape == (E, B)
    assert prepared["b1"].shape[0] == E

    TB = _choose_tile(B, block_b)
    n_tiles = pl.cdiv(B, TB)

    itemsize = jnp.dtype(head_t.dtype).itemsize
    cost = pl.CostEstimate(
        flops=2 * B * (2 * E * E + E * E),          # both matmuls
        transcendentals=B * E,                       # tanh
        bytes_accessed=3 * B * E * itemsize + 3 * E * E * 2 + 2 * E * 4,
    )

    return pl.pallas_call(
        _combiner_kernel,
        out_shape=jax.ShapeDtypeStruct((E, B), head_t.dtype),
        grid=(n_tiles,),
        in_specs=[
            # Streaming activation tiles (double-buffered by the pipeline).
            pl.BlockSpec((E, TB), lambda i: (0, i)),      # head^T
            pl.BlockSpec((E, TB), lambda i: (0, i)),      # modifier^T
            # Weights / biases: constant index_map -> loaded once, resident.
            pl.BlockSpec((E, 2 * E), lambda i: (0, 0)),   # W1
            pl.BlockSpec((E, 1), lambda i: (0, 0)),       # b1
            pl.BlockSpec((E, E), lambda i: (0, 0)),       # W2
            pl.BlockSpec((E, 1), lambda i: (0, 0)),       # b2
        ],
        out_specs=pl.BlockSpec((E, TB), lambda i: (0, i)),
        compiler_params=pltpu.CompilerParams(
            dimension_semantics=("parallel",)),
        cost_estimate=cost,
    )(head_t, modifier_t,
      prepared["w1"], prepared["b1"], prepared["w2"], prepared["b2"])


def mlp_combiner_forward(head_embed, modifier_embed, prepared, *, block_b=4096):
    """(B, E)-layout convenience wrapper matching the PyTorch module interface.

    The transposes are XLA-level layout plumbing outside the kernel; callers
    that already keep activations batch-last should use mlp_combiner_forward_t.
    """
    out_t = mlp_combiner_forward_t(head_embed.T, modifier_embed.T, prepared,
                                   block_b=block_b)
    return out_t.T


def init_params(key, embedding_dim):
    """Deterministic init matching nn.Linear shapes (uniform(-1/sqrt(in), 1/sqrt(in)))."""
    E = embedding_dim
    k1, k2, k3, k4 = jax.random.split(key, 4)
    lim1 = 1.0 / jnp.sqrt(2.0 * E)
    lim2 = 1.0 / jnp.sqrt(1.0 * E)
    return {
        "w1": jax.random.uniform(k1, (E, 2 * E), jnp.float32, -lim1, lim1),
        "b1": jax.random.uniform(k2, (E,), jnp.float32, -lim1, lim1),
        "w2": jax.random.uniform(k3, (E, E), jnp.float32, -lim2, lim2),
        "b2": jax.random.uniform(k4, (E,), jnp.float32, -lim2, lim2),
    }


def reference_forward(head_embed, modifier_embed, params):
    x = jnp.concatenate([head_embed, modifier_embed], axis=-1)
    h = jnp.tanh(x @ params["w1"].T + params["b1"])
    return h @ params["w2"].T + params["b2"]


if __name__ == "__main__":
    E = 32  # embedding_dim
    key = jax.random.PRNGKey(0)
    k_h, k_m, k_p = jax.random.split(key, 3)
    params = init_params(k_p, E)
    prepared = prepare_params(params)  # one-time bf16 cast / bias reshape

    # --- small check (B = 8): single grid step, (B, E) convenience wrapper ---
    B = 8
    head_embed = jax.random.normal(k_h, (B, E), jnp.float32)
    modifier_embed = jax.random.normal(k_m, (B, E), jnp.float32)
    out = jax.block_until_ready(
        mlp_combiner_forward(head_embed, modifier_embed, prepared))
    ref = reference_forward(head_embed, modifier_embed, params)
    assert out.shape == (B, E)
    # bf16 MXU operands (f32 accumulation) -> relaxed tolerance vs f32 reference.
    assert jnp.allclose(out, ref, atol=5e-2, rtol=5e-2), "mismatch vs reference (B=8)"

    # --- larger check (B = 300): 2-tile parallel grid + partial last block ---
    # (no wrapper-side padding or output slicing; lane-dense transposed entry)
    B2 = 300
    k_h2, k_m2 = jax.random.split(jax.random.PRNGKey(1), 2)
    head2 = jax.random.normal(k_h2, (B2, E), jnp.float32)
    mod2 = jax.random.normal(k_m2, (B2, E), jnp.float32)
    out2_t = jax.block_until_ready(
        mlp_combiner_forward_t(head2.T, mod2.T, prepared, block_b=4096))
    ref2 = reference_forward(head2, mod2, params)
    assert out2_t.shape == (E, B2)
    assert jnp.allclose(out2_t.T, ref2, atol=5e-2, rtol=5e-2), \
        "mismatch vs reference (B=300)"

    print("KERNEL_OK")
</pallas_src>

<mosaic_0001>
module attributes {stable_mosaic.version = 11 : i64} {
  func.func @_combiner_kernel(%arg0: i32, %arg1: memref<32x8xf32, #tpu.memory_space<vmem>>, %arg2: memref<32x8xf32, #tpu.memory_space<vmem>>, %arg3: memref<32x64xbf16, #tpu.memory_space<vmem>>, %arg4: memref<32x1xf32, #tpu.memory_space<vmem>>, %arg5: memref<32x32xbf16, #tpu.memory_space<vmem>>, %arg6: memref<32x1xf32, #tpu.memory_space<vmem>>, %arg7: memref<32x8xf32, #tpu.memory_space<vmem>>) attributes {dimension_semantics = [#tpu.dimension_semantics<parallel>], iteration_bounds = array<i64: 1>, scalar_prefetch = 0 : i64, scratch_operands = 0 : i64, tpu.core_type = #tpu.core_type<tc>, window_params = [{transform_indices = @transform_0, window_bounds = array<i64: 32, 8>}, {transform_indices = @transform_1, window_bounds = array<i64: 32, 8>}, {pipeline_mode = #tpu.pipeline_mode<synchronous>, transform_indices = @transform_2, window_bounds = array<i64: 32, 64>}, {pipeline_mode = #tpu.pipeline_mode<synchronous>, transform_indices = @transform_3, window_bounds = array<i64: 32, 1>}, {pipeline_mode = #tpu.pipeline_mode<synchronous>, transform_indices = @transform_4, window_bounds = array<i64: 32, 32>}, {pipeline_mode = #tpu.pipeline_mode<synchronous>, transform_indices = @transform_5, window_bounds = array<i64: 32, 1>}, {transform_indices = @transform_6, window_bounds = array<i64: 32, 8>}]} {
    %c0 = arith.constant 0 : index
    %c0_0 = arith.constant 0 : index
    %0 = vector.load %arg1[%c0, %c0_0] : memref<32x8xf32, #tpu.memory_space<vmem>>, vector<32x8xf32>
    %c0_1 = arith.constant 0 : index
    %c0_2 = arith.constant 0 : index
    %1 = vector.load %arg2[%c0_1, %c0_2] : memref<32x8xf32, #tpu.memory_space<vmem>>, vector<32x8xf32>
    %2 = tpu.concatenate %0, %1 in 0 : vector<32x8xf32>, vector<32x8xf32> -> vector<64x8xf32>
    %3 = arith.truncf %2 : vector<64x8xf32> to vector<64x8xbf16>
    %c0_3 = arith.constant 0 : index
    %c0_4 = arith.constant 0 : index
    %4 = vector.load %arg3[%c0_3, %c0_4] : memref<32x64xbf16, #tpu.memory_space<vmem>>, vector<32x64xbf16>
    %cst = arith.constant dense<0.000000e+00> : vector<32x8xf32>
    %5 = tpu.matmul %4, %3, %cst {dimension_numbers = #tpu.dot_dimension_numbers<[1], [0], [0], [1], [0, 0, 1, 1], [], []>} : vector<32x64xbf16>, vector<64x8xbf16>, vector<32x8xf32> -> vector<32x8xf32>
    %c0_5 = arith.constant 0 : index
    %c0_6 = arith.constant 0 : index
    %6 = vector.load %arg4[%c0_5, %c0_6] : memref<32x1xf32, #tpu.memory_space<vmem>>, vector<32x1xf32>
    %7 = vector.broadcast %6 : vector<32x1xf32> to vector<32x8xf32>
    %8 = arith.addf %5, %7 : vector<32x8xf32>
    %9 = math.tanh %8 : vector<32x8xf32>
    %c0_7 = arith.constant 0 : index
    %c0_8 = arith.constant 0 : index
    %10 = vector.load %arg5[%c0_7, %c0_8] : memref<32x32xbf16, #tpu.memory_space<vmem>>, vector<32x32xbf16>
    %11 = arith.truncf %9 : vector<32x8xf32> to vector<32x8xbf16>
    %cst_9 = arith.constant dense<0.000000e+00> : vector<32x8xf32>
    %12 = tpu.matmul %10, %11, %cst_9 {dimension_numbers = #tpu.dot_dimension_numbers<[1], [0], [0], [1], [0, 0, 1, 1], [], []>} : vector<32x32xbf16>, vector<32x8xbf16>, vector<32x8xf32> -> vector<32x8xf32>
    %c0_10 = arith.constant 0 : index
    %c0_11 = arith.constant 0 : index
    %13 = vector.load %arg6[%c0_10, %c0_11] : memref<32x1xf32, #tpu.memory_space<vmem>>, vector<32x1xf32>
    %14 = vector.broadcast %13 : vector<32x1xf32> to vector<32x8xf32>
    %15 = arith.addf %12, %14 : vector<32x8xf32>
    %c0_12 = arith.constant 0 : index
    %c0_13 = arith.constant 0 : index
    %16 = vector.load %arg7[%c0_12, %c0_13] : memref<32x8xf32, #tpu.memory_space<vmem>>, vector<32x8xf32>
    tpu.vector_store %arg7[%c0_12, %c0_13], %15 {strides = array<i32>} : memref<32x8xf32, #tpu.memory_space<vmem>>, vector<32x8xf32>,
    return
  }
  func.func @transform_0(%arg0: i32) -> (i32, i32) {
    %c0_i32 = arith.constant 0 : i32
    %c0_i32_0 = arith.constant 0 : i32
    return %c0_i32, %arg0 : i32, i32
  }
  func.func @transform_1(%arg0: i32) -> (i32, i32) {
    %c0_i32 = arith.constant 0 : i32
    %c0_i32_0 = arith.constant 0 : i32
    return %c0_i32, %arg0 : i32, i32
  }
  func.func @transform_2(%arg0: i32) -> (i32, i32) {
    %c0_i32 = arith.constant 0 : i32
    %c0_i32_0 = arith.constant 0 : i32
    %c0_i32_1 = arith.constant 0 : i32
    return %c0_i32, %c0_i32_0 : i32, i32
  }
  func.func @transform_3(%arg0: i32) -> (i32, i32) {
    %c0_i32 = arith.constant 0 : i32
    %c0_i32_0 = arith.constant 0 : i32
    %c0_i32_1 = arith.constant 0 : i32
    return %c0_i32, %c0_i32_0 : i32, i32
  }
  func.func @transform_4(%arg0: i32) -> (i32, i32) {
    %c0_i32 = arith.constant 0 : i32
    %c0_i32_0 = arith.constant 0 : i32
    %c0_i32_1 = arith.constant 0 : i32
    return %c0_i32, %c0_i32_0 : i32, i32
  }
  func.func @transform_5(%arg0: i32) -> (i32, i32) {
    %c0_i32 = arith.constant 0 : i32
    %c0_i32_0 = arith.constant 0 : i32
    %c0_i32_1 = arith.constant 0 : i32
    return %c0_i32, %c0_i32_0 : i32, i32
  }
  func.func @transform_6(%arg0: i32) -> (i32, i32) {
    %c0_i32 = arith.constant 0 : i32
    %c0_i32_0 = arith.constant 0 : i32
    return %c0_i32, %arg0 : i32, i32
  }
}

</mosaic_0001>

<bundles_post_ra>
// kernel: tpu_custom_call.1
= control target key start
LH: loop header
LB: loop body
LE: loop exit
PB: predicated region body
PF: predicated region fallthrough
CT: control target
= control target key end

     0   :  { %v221_v3 = vmov 0   ;;  %vm74_vm0 = vcmask 523264   ;;  %vm144_vm1 = vcmask 261120   ;;  %vm170_vm2 = vcmask 64512   ;;  %s329_s1 = inlined_call_operand.vmem [shape: f32[32,8], index: 1, kind: input, shape index: {}]   ;;  %s330_s3 = inlined_call_operand.vmem [shape: f32[32,1], index: 3, kind: input, shape index: {}]   ;;  %s331_s0 = inlined_call_operand.vmem [shape: f32[32,8], index: 0, kind: input, shape index: {}]   ;;  %s332_s2 = inlined_call_operand.vmem [shape: bf16[32,64], index: 2, kind: input, shape index: {}]   ;;  %s333_s5 = inlined_call_operand.vmem [shape: f32[32,1], index: 5, kind: input, shape index: {}]   ;;  %s334_s4 = inlined_call_operand.vmem [shape: bf16[32,32], index: 4, kind: input, shape index: {}]   ;;  %s335_s6 = inlined_call_operand.vmem [shape: f32[32,8], index: 6, kind: output, shape index: {}]  }
   0x1   :  { %v30_v0 = vld [vmem:[%s329_s1 + $0x10] sm:$0xff]  ;;  %v31_v1 = vld [vmem:[%s329_s1 + $0x18] sm:$0xff]  ;;  %v28_v2 = vld [vmem:[%s329_s1] sm:$0xff]  ;;  %210 = vset.pattern.permute.xlu0 %v221_v3  ;;  %211 = vset.pattern.permute.xlu1 %v221_v3 }
   0x2   :  { %v35_v4 = vpack.c.bf16 %v31_v1, %v30_v0  ;;  %v29_v5 = vld [vmem:[%s329_s1 + $0x8] sm:$0xff]  ;;  %212 = vset.pattern.permute.xlu2 %v221_v3  ;;  %v42_v7 = vld [vmem:[%s330_s3 + $0x10] sm:$0xff]  ;;  %v40_v8 = vld [vmem:[%s330_s3] sm:$0xff] }
   0x3   :  { %v34_v6 = vpack.c.bf16 %v29_v5, %v28_v2  ;;  %v26_v9 = vld [vmem:[%s331_s0 + $0x10] sm:$0xff]  ;;  %v27_v10 = vld [vmem:[%s331_s0 + $0x18] sm:$0xff]  ;;  %56 = vperm.xlu0 %210, %v42_v7   ;;  %46 = vperm.xlu1 %211, %v40_v8   ;;  %v24_v12 = vld [vmem:[%s331_s0] sm:$0xff] }
   0x4   :  { %203 = vmatpush.bf16.msra.mxu2 %v35_v4  ;;  %85 = vmatpush.bf16.msra.mxu0 %v35_v4  ;;  %v33_v11 = vpack.c.bf16 %v27_v10, %v26_v9  ;;  %v25_v13 = vld [vmem:[%s331_s0 + $0x8] sm:$0xff]  ;;  %v43_v14 = vld [vmem:[%s330_s3 + $0x18] sm:$0xff]  ;;  %v199_v18 = vld [vmem:[%s332_s2] sm:$0xff] }
   0x5   :  { %v41_v15 = vld [vmem:[%s330_s3 + $0x8] sm:$0xff]  ;;  %v32_v16 = vpack.c.bf16 %v25_v13, %v24_v12  ;;  %v112_v19 = vld [vmem:[%s333_s5 + $0x10] sm:$0xff]  ;;  %v113_v20 = vld [vmem:[%s333_s5 + $0x18] sm:$0xff] }
   0x6   :  { %v200_v17 = vld [vmem:[%s332_s2 + $0x8] sm:$0xff]  ;;  %v110_v21 = vld [vmem:[%s333_s5] sm:$0xff] }
   0x7   :  { %116 = vperm.xlu2 %212, %v110_v21   ;;  %v111_v26 = vld [vmem:[%s333_s5 + $0x8] sm:$0xff]  ;;  %v201_v41 = vld [vmem:[%s334_s4] sm:$0xff] }
   0x8   :  { %204 = vmatpush.bf16.msra.mxu2 %v34_v6  ;;  %86 = vmatpush.bf16.msra.mxu0 %v34_v6  ;;  %v202_v42 = vld [vmem:[%s334_s4 + $0x8] sm:$0xff] }
   0xb   :  { %61 = vperm.xlu0 %210, %v43_v14   ;;  %51 = vperm.xlu1 %211, %v41_v15  }
   0xc   :  { %205 = vmatpush.bf16.msra.mxu2 %v33_v11  ;;  %87 = vmatpush.bf16.msra.mxu0 %v33_v11 }
   0xf   :  { %121 = vperm.xlu2 %212, %v111_v26  }
  0x10   :  { %206 = vmatpush.bf16.msra.mxu2 %v32_v16  ;;  %88 = vmatpush.bf16.msra.mxu0 %v32_v16 }
  0x13   :  { %188 = vmatmul.msk.bf16.vlgmr.msra.gmra.mxu2 %vm74_vm0, %v200_v17  ;;  %187 = vmatmul.msk.bf16.vlgmr.msra.gmra.mxu0 %vm74_vm0, %v199_v18 }
  0x14   :  { %126 = vperm.xlu0 %210, %v112_v19   ;;  %131 = vperm.xlu1 %211, %v113_v20  }
  0x61   :  { %v117_v43 = vpop.permute.xlu2 %116 }
  0x69   :  { %v122_v49 = vpop.permute.xlu2 %121 }
  0x75   :  { %v57_v23 = vpop.permute.xlu0 %56  ;;  %v47_v24 = vpop.permute.xlu1 %46 }
  0x7d   :  { %v62_v29 = vpop.permute.xlu0 %61  ;;  %v52_v30 = vpop.permute.xlu1 %51 }
  0x86   :  { %v127_v46 = vpop.permute.xlu0 %126  ;;  %v132_v52 = vpop.permute.xlu1 %131 }
  0x90   :  { %v90_v22 = vpop.f32.mrf.mxu0 }
  0x91   :  { %v91_v31 = vadd.f32 %v90_v22, %v47_v24 }
  0x96   :  { %v95_v25 = vpop.f32.mrf.mxu2 }
  0x97   :  { %v96_v27 = vadd.f32 %v95_v25, %v57_v23 }
  0x98   :  { %v92_v28 = vpop.f32.mrf.mxu0 }
  0x99   :  { %v93_v33 = vadd.f32 %v92_v28, %v52_v30  ;;  %213 = vtanh.f32 %v96_v27 }
  0x9e   :  { %v97_v32 = vpop.f32.mrf.mxu2 }
  0x9f   :  { %v98_v34 = vadd.f32 %v97_v32, %v62_v29  ;;  %v214_v35 = vpop.eup %213 }
  0xa1   :  { %215 = vtanh.f32 %v98_v34 }
  0xa2   :  { %217 = vtanh.f32 %v91_v31 }
  0xa3   :  { %219 = vtanh.f32 %v93_v33 }
  0xa7   :  { %v216_v36 = vpop.eup %215 }
  0xa8   :  { %v218_v37 = vpop.eup %217  ;;  %v109_v38 = vpack.c.bf16 %v216_v36, %v214_v35 }
  0xa9   :  { %v220_v39 = vpop.eup %219 }
  0xaa   :  { %157 = vmatpush.bf16.msra.mxu1 %v109_v38  ;;  %207 = vmatpush.bf16.msra.mxu3 %v109_v38  ;;  %v108_v40 = vpack.c.bf16 %v220_v39, %v218_v37 }
  0xae   :  { %158 = vmatpush.bf16.msra.mxu1 %v108_v40  ;;  %208 = vmatpush.bf16.msra.mxu3 %v108_v40 }
  0xb1   :  { %197 = vmatmul.msk.bf16.vlgmr.msra.gmra.mxu1 %vm144_vm1, %v201_v41  ;;  %198 = vmatmul.msk.bf16.vlgmr.msra.gmra.mxu3 %vm144_vm1, %v202_v42 }
 0x12e   :  { %v160_v44 = vpop.f32.mrf.mxu1 }
 0x12f   :  { %v161_v45 = vadd.f32 %v160_v44, %v117_v43 }
 0x131   :  { %171 = vst.msk [vmem:[%s335_s6] sm:$0xff] %vm170_vm2, %v161_v45 }
 0x134   :  { %v165_v47 = vpop.f32.mrf.mxu3 }
 0x135   :  { %v166_v48 = vadd.f32 %v165_v47, %v127_v46 }
 0x136   :  { %v162_v50 = vpop.f32.mrf.mxu1 }
 0x137   :  { %173 = vst.msk [vmem:[%s335_s6 + $0x10] sm:$0xff] %vm170_vm2, %v166_v48  ;;  %v163_v51 = vadd.f32 %v162_v50, %v122_v49 }
 0x139   :  { %172 = vst.msk [vmem:[%s335_s6 + $0x8] sm:$0xff] %vm170_vm2, %v163_v51 }
 0x13c   :  { %v167_v53 = vpop.f32.mrf.mxu3 }
 0x13d   :  { %v168_v54 = vadd.f32 %v167_v53, %v132_v52 }
 0x13f   :  { %174 = vst.msk [vmem:[%s335_s6 + $0x18] sm:$0xff] %vm170_vm2, %v168_v54 }

</bundles_post_ra>
